<compile_context>
chip_gen: v5e
topology: v5e:2x2
jax: 0.10.0
libtpu: 0.0.40
codegen_flags: <defaults>
</compile_context>

<pallas_src>
import math
from functools import partial

import jax
import jax.numpy as jnp
from jax.experimental import pallas as pl
from jax.experimental.pallas import tpu as pltpu


# ----------------------------------------------------------------------------
# Kernels
# ----------------------------------------------------------------------------
def _ffn_resident_kernel(x_ref, w1_ref, b1_ref, w2_ref, b2_ref, o_ref):
    """Weights fully VMEM-resident.  out = relu(x @ W1 + b1) @ W2 + b2."""
    x = x_ref[...].astype(jnp.bfloat16)
    h = jnp.dot(x, w1_ref[...], preferred_element_type=jnp.float32)
    h = jnp.maximum(h + b1_ref[...].astype(jnp.float32), 0.0)
    # TODO(synk): training-mode dropout (p=0.1) would Bernoulli-mask `h` here
    # via pltpu.prng_seed / pltpu.prng_random_bits; this matches eval-mode
    # (identity) dropout, the standard inference semantics of nn.Dropout.
    out = jnp.dot(h.astype(jnp.bfloat16), w2_ref[...],
                  preferred_element_type=jnp.float32)
    o_ref[...] = (out + b2_ref[...].astype(jnp.float32)).astype(o_ref.dtype)


def _ffn_stream_kernel(x_ref, w1_ref, b1_ref, w2_ref, b2_ref, o_ref, acc_ref):
    """d_ff tiled (reduction axis last); f32 accumulator in VMEM scratch."""
    j = pl.program_id(1)

    @pl.when(j == 0)
    def _init():
        acc_ref[...] = jnp.zeros_like(acc_ref)

    x = x_ref[...].astype(jnp.bfloat16)
    h = jnp.dot(x, w1_ref[...], preferred_element_type=jnp.float32)
    h = jnp.maximum(h + b1_ref[...].astype(jnp.float32), 0.0)
    # TODO(synk): training-mode dropout mask would be applied to `h` here.
    acc_ref[...] += jnp.dot(h.astype(jnp.bfloat16), w2_ref[...],
                            preferred_element_type=jnp.float32)

    @pl.when(j == pl.num_programs(1) - 1)
    def _finalize():
        o_ref[...] = (acc_ref[...] +
                      b2_ref[...].astype(jnp.float32)).astype(o_ref.dtype)


# ----------------------------------------------------------------------------
# Sizing helpers
# ----------------------------------------------------------------------------
def _vmem_budget_bytes():
    """Per-core VMEM budget with ~25% headroom (v5e/v6e 128 MiB, v7x 64 MiB)."""
    try:
        cap = pltpu.get_tpu_info().vmem_capacity_bytes
    except Exception:
        cap = 64 * 1024 * 1024          # conservative: v7x physical VMEM
    return int(cap * 0.75)


def _pick_reduction_tile(F, cap, align=128):
    """Largest align-multiple <= cap that divides F exactly; else full F.

    Exact divisibility (or full extent) keeps padding out of the reduction."""
    if F <= cap:
        return F
    t = (cap // align) * align
    while t >= align:
        if F % t == 0:
            return t
        t -= align
    return F


def _resident_vmem_bytes(tm, D, F, xb, wb, ob):
    w = 2 * (D * F + F * D) * wb             # W1 + W2 (assume double-buffered)
    xio = 2 * tm * D * (xb + ob)             # x tile + out tile (double-buffered)
    hid = tm * F * (4 + wb)                  # f32 hidden + bf16 cast copy
    bias = 2 * (F + D) * 4 * 2
    return w + xio + hid + bias


def _stream_vmem_bytes(tm, tf, D, F, xb, wb, ob):
    w = 2 * (D * tf + tf * D) * wb
    xio = 2 * tm * D * (xb + ob)
    acc = tm * D * 4
    hid = tm * tf * (4 + wb)
    bias = 2 * (tf + D) * 4 * 2
    return w + xio + acc + hid + bias


def _row_tile_candidates(M, tm_cap):
    cands = sorted({c for c in (tm_cap, 1024, 512, 384, 256, 128) if c <= tm_cap},
                   reverse=True)
    out = []
    for c in cands:
        out.append(M if M <= c else c)       # full extent if it fits; else 128-mult
    # dedup preserving order
    seen, uniq = set(), []
    for t in out:
        if t not in seen:
            seen.add(t)
            uniq.append(t)
    return uniq or [M]


# ----------------------------------------------------------------------------
# Wrapper
# ----------------------------------------------------------------------------
def feed_forward(x2d, w1, b1, w2, b2, *, tm_cap=512, tf_cap=512, out_dtype=None):
    """x2d: (M, D); w1: (D, F) bf16; b1: (F,); w2: (F, D) bf16; b2: (D,) -> (M, D)."""
    M, D = x2d.shape
    F = w1.shape[1]
    out_dtype = x2d.dtype if out_dtype is None else out_dtype

    xb = jnp.dtype(x2d.dtype).itemsize
    wb = jnp.dtype(w1.dtype).itemsize
    ob = jnp.dtype(out_dtype).itemsize

    budget = _vmem_budget_bytes()
    fit = int(budget * 0.85)                 # leave slack inside the scoped limit

    b1_2d = b1.reshape(1, F).astype(jnp.float32)
    b2_2d = b2.reshape(1, D).astype(jnp.float32)
    tm_cands = _row_tile_candidates(M, tm_cap)

    # ---------- Path A: W1/W2 fully VMEM-resident -------------------------------
    tm_res = next((t for t in tm_cands
                   if _resident_vmem_bytes(t, D, F, xb, wb, ob) <= fit), None)
    if tm_res is not None:
        tm = tm_res
        grid_m = pl.cdiv(M, tm)
        flops = 4 * M * D * F
        bytes_accessed = M * D * (xb + ob) + 2 * D * F * wb + (F + D) * 4
        return pl.pallas_call(
            _ffn_resident_kernel,
            out_shape=jax.ShapeDtypeStruct((M, D), out_dtype),
            grid=(grid_m,),
            in_specs=[
                pl.BlockSpec((tm, D), lambda i: (i, 0)),    # x row tile
                pl.BlockSpec((D, F), lambda i: (0, 0)),     # W1 (resident)
                pl.BlockSpec((1, F), lambda i: (0, 0)),     # b1 (resident)
                pl.BlockSpec((F, D), lambda i: (0, 0)),     # W2 (resident)
                pl.BlockSpec((1, D), lambda i: (0, 0)),     # b2 (resident)
            ],
            out_specs=pl.BlockSpec((tm, D), lambda i: (i, 0)),   # lane-dense
            compiler_params=pltpu.CompilerParams(
                dimension_semantics=("parallel",),
                vmem_limit_bytes=budget),
            cost_estimate=pl.CostEstimate(
                flops=flops, transcendentals=0, bytes_accessed=bytes_accessed),
        )(x2d, w1, b1_2d, w2, b2_2d)

    # ---------- Path B: stream weights, reduce over d_ff tiles ------------------
    tf = _pick_reduction_tile(F, tf_cap, 128)
    tm = next((t for t in tm_cands
               if _stream_vmem_bytes(t, tf, D, F, xb, wb, ob) <= fit),
              tm_cands[-1])
    grid_m = pl.cdiv(M, tm)
    grid = (grid_m, F // tf)

    flops = 4 * M * D * F
    bytes_accessed = (M * D * (xb + ob)                       # x once, out once
                      + grid_m * 2 * D * F * wb               # weights re-streamed
                      + grid_m * F * 4 + D * 4)               # biases
    return pl.pallas_call(
        _ffn_stream_kernel,
        out_shape=jax.ShapeDtypeStruct((M, D), out_dtype),
        grid=grid,
        in_specs=[
            pl.BlockSpec((tm, D), lambda i, j: (i, 0)),   # x row tile (reused over j)
            pl.BlockSpec((D, tf), lambda i, j: (0, j)),   # W1 column tile
            pl.BlockSpec((1, tf), lambda i, j: (0, j)),   # b1 tile
            pl.BlockSpec((tf, D), lambda i, j: (j, 0)),   # W2 row tile
            pl.BlockSpec((1, D), lambda i, j: (0, 0)),    # b2 (whole)
        ],
        out_specs=pl.BlockSpec((tm, D), lambda i, j: (i, 0)),   # lane-dense (tm, D)
        scratch_shapes=[pltpu.VMEM((tm, D), jnp.float32)],      # f32 accumulator
        compiler_params=pltpu.CompilerParams(
            dimension_semantics=("parallel", "arbitrary"),
            vmem_limit_bytes=budget),
        cost_estimate=pl.CostEstimate(
            flops=flops, transcendentals=0, bytes_accessed=bytes_accessed),
    )(x2d, w1, b1_2d, w2, b2_2d)


# ----------------------------------------------------------------------------
# Module wrapper (plain-JAX glue: flatten leading dims only)
# ----------------------------------------------------------------------------
class FeedForward:
    def __init__(self, d_model, d_ff=1024, dropout=0.1, *, key):
        self.d_model, self.d_ff, self.p_drop = d_model, d_ff, dropout

        # Deterministic PyTorch-nn.Linear-style init: uniform(-1/sqrt(in), 1/sqrt(in)).
        k1, k2, k3, k4 = jax.random.split(key, 4)
        bnd1 = 1.0 / math.sqrt(d_model)
        bnd2 = 1.0 / math.sqrt(d_ff)
        # Stored pre-transposed as (D_in, D_out); f32 masters + bf16 MXU copies.
        self.W1 = jax.random.uniform(k1, (d_model, d_ff), jnp.float32, -bnd1, bnd1)
        self.b1 = jax.random.uniform(k2, (d_ff,), jnp.float32, -bnd1, bnd1)
        self.W2 = jax.random.uniform(k3, (d_ff, d_model), jnp.float32, -bnd2, bnd2)
        self.b2 = jax.random.uniform(k4, (d_model,), jnp.float32, -bnd2, bnd2)
        self.W1_lo = self.W1.astype(jnp.bfloat16)
        self.W2_lo = self.W2.astype(jnp.bfloat16)

    def __call__(self, x):
        lead = x.shape[:-1]
        M = int(math.prod(lead)) if lead else 1
        x2d = x.reshape(M, self.d_model)
        y = feed_forward(x2d, self.W1_lo, self.b1, self.W2_lo, self.b2)
        return y.reshape(*lead, self.d_model)


# ----------------------------------------------------------------------------
# Pure-JAX f32 reference (eval-mode dropout == identity) for a correctness check
# ----------------------------------------------------------------------------
def reference(ffn, x):
    h = jnp.maximum(x @ ffn.W1 + ffn.b1, 0.0)
    return h @ ffn.W2 + ffn.b2


if __name__ == "__main__":
    B, S, d_model, d_ff = 2, 8, 32, 1024   # small shapes; d_ff is the module default

    key = jax.random.PRNGKey(0)
    k_param, k_x = jax.random.split(key)

    ffn = FeedForward(d_model, d_ff, key=k_param)
    x = jax.random.normal(k_x, (B, S, d_model), jnp.float32)

    out = jax.block_until_ready(ffn(x))

    ref = reference(ffn, x)
    assert out.shape == (B, S, d_model)
    # bf16 MXU inputs with f32 accumulation -> small rounding error vs f32 reference.
    assert jnp.max(jnp.abs(out - ref)) < 3e-2, "mismatch vs pure-JAX reference"

    print("KERNEL_OK")
</pallas_src>

<mosaic_0001>
module attributes {stable_mosaic.version = 11 : i64} {
  func.func @_ffn_resident_kernel(%arg0: i32, %arg1: memref<16x32xf32, #tpu.memory_space<vmem>>, %arg2: memref<32x1024xbf16, #tpu.memory_space<vmem>>, %arg3: memref<1x1024xf32, #tpu.memory_space<vmem>>, %arg4: memref<1024x32xbf16, #tpu.memory_space<vmem>>, %arg5: memref<1x32xf32, #tpu.memory_space<vmem>>, %arg6: memref<16x32xf32, #tpu.memory_space<vmem>>) attributes {dimension_semantics = [#tpu.dimension_semantics<parallel>], iteration_bounds = array<i64: 1>, scalar_prefetch = 0 : i64, scratch_operands = 0 : i64, tpu.core_type = #tpu.core_type<tc>, window_params = [{transform_indices = @transform_0, window_bounds = array<i64: 16, 32>}, {pipeline_mode = #tpu.pipeline_mode<synchronous>, transform_indices = @transform_1, window_bounds = array<i64: 32, 1024>}, {pipeline_mode = #tpu.pipeline_mode<synchronous>, transform_indices = @transform_2, window_bounds = array<i64: 1, 1024>}, {pipeline_mode = #tpu.pipeline_mode<synchronous>, transform_indices = @transform_3, window_bounds = array<i64: 1024, 32>}, {pipeline_mode = #tpu.pipeline_mode<synchronous>, transform_indices = @transform_4, window_bounds = array<i64: 1, 32>}, {transform_indices = @transform_5, window_bounds = array<i64: 16, 32>}]} {
    %c0 = arith.constant 0 : index
    %c0_0 = arith.constant 0 : index
    %0 = vector.load %arg1[%c0, %c0_0] : memref<16x32xf32, #tpu.memory_space<vmem>>, vector<16x32xf32>
    %1 = arith.truncf %0 : vector<16x32xf32> to vector<16x32xbf16>
    %c0_1 = arith.constant 0 : index
    %c0_2 = arith.constant 0 : index
    %2 = vector.load %arg2[%c0_1, %c0_2] : memref<32x1024xbf16, #tpu.memory_space<vmem>>, vector<32x1024xbf16>
    %cst = arith.constant dense<0.000000e+00> : vector<16x1024xf32>
    %3 = tpu.matmul %1, %2, %cst {dimension_numbers = #tpu.dot_dimension_numbers<[1], [0], [0], [1], [0, 0, 1, 1], [], []>} : vector<16x32xbf16>, vector<32x1024xbf16>, vector<16x1024xf32> -> vector<16x1024xf32>
    %c0_3 = arith.constant 0 : index
    %c0_4 = arith.constant 0 : index
    %4 = vector.load %arg3[%c0_3, %c0_4] : memref<1x1024xf32, #tpu.memory_space<vmem>>, vector<1x1024xf32>
    %5 = vector.broadcast %4 : vector<1x1024xf32> to vector<16x1024xf32>
    %6 = arith.addf %3, %5 : vector<16x1024xf32>
    %cst_5 = arith.constant 0.000000e+00 : f32
    %7 = vector.broadcast %cst_5 : f32 to vector<16x1024xf32>
    %8 = arith.maximumf %6, %7 : vector<16x1024xf32>
    %9 = arith.truncf %8 : vector<16x1024xf32> to vector<16x1024xbf16>
    %c0_6 = arith.constant 0 : index
    %c0_7 = arith.constant 0 : index
    %10 = vector.load %arg4[%c0_6, %c0_7] : memref<1024x32xbf16, #tpu.memory_space<vmem>>, vector<1024x32xbf16>
    %cst_8 = arith.constant dense<0.000000e+00> : vector<16x32xf32>
    %11 = tpu.matmul %9, %10, %cst_8 {dimension_numbers = #tpu.dot_dimension_numbers<[1], [0], [0], [1], [0, 0, 1, 1], [], []>} : vector<16x1024xbf16>, vector<1024x32xbf16>, vector<16x32xf32> -> vector<16x32xf32>
    %c0_9 = arith.constant 0 : index
    %c0_10 = arith.constant 0 : index
    %12 = vector.load %arg5[%c0_9, %c0_10] : memref<1x32xf32, #tpu.memory_space<vmem>>, vector<1x32xf32>
    %13 = vector.broadcast %12 : vector<1x32xf32> to vector<16x32xf32>
    %14 = arith.addf %11, %13 : vector<16x32xf32>
    %c0_11 = arith.constant 0 : index
    %c0_12 = arith.constant 0 : index
    %15 = vector.load %arg6[%c0_11, %c0_12] : memref<16x32xf32, #tpu.memory_space<vmem>>, vector<16x32xf32>
    tpu.vector_store %arg6[%c0_11, %c0_12], %14 {strides = array<i32>} : memref<16x32xf32, #tpu.memory_space<vmem>>, vector<16x32xf32>,
    return
  }
  func.func @transform_0(%arg0: i32) -> (i32, i32) {
    %c0_i32 = arith.constant 0 : i32
    %c0_i32_0 = arith.constant 0 : i32
    return %arg0, %c0_i32 : i32, i32
  }
  func.func @transform_1(%arg0: i32) -> (i32, i32) {
    %c0_i32 = arith.constant 0 : i32
    %c0_i32_0 = arith.constant 0 : i32
    %c0_i32_1 = arith.constant 0 : i32
    return %c0_i32, %c0_i32_0 : i32, i32
  }
  func.func @transform_2(%arg0: i32) -> (i32, i32) {
    %c0_i32 = arith.constant 0 : i32
    %c0_i32_0 = arith.constant 0 : i32
    %c0_i32_1 = arith.constant 0 : i32
    return %c0_i32, %c0_i32_0 : i32, i32
  }
  func.func @transform_3(%arg0: i32) -> (i32, i32) {
    %c0_i32 = arith.constant 0 : i32
    %c0_i32_0 = arith.constant 0 : i32
    %c0_i32_1 = arith.constant 0 : i32
    return %c0_i32, %c0_i32_0 : i32, i32
  }
  func.func @transform_4(%arg0: i32) -> (i32, i32) {
    %c0_i32 = arith.constant 0 : i32
    %c0_i32_0 = arith.constant 0 : i32
    %c0_i32_1 = arith.constant 0 : i32
    return %c0_i32, %c0_i32_0 : i32, i32
  }
  func.func @transform_5(%arg0: i32) -> (i32, i32) {
    %c0_i32 = arith.constant 0 : i32
    %c0_i32_0 = arith.constant 0 : i32
    return %arg0, %c0_i32 : i32, i32
  }
}

</mosaic_0001>

<bundles_post_ra>
// kernel: tpu_custom_call.1
= control target key start
LH: loop header
LB: loop body
LE: loop exit
PB: predicated region body
PF: predicated region fallthrough
CT: control target
= control target key end

     0   :  { %vm139_vm0 = vcmask 261120   ;;  %s1731_s0 = inlined_call_operand.vmem [shape: f32[16,32], index: 0, kind: input, shape index: {}]   ;;  %s1732_s1 = inlined_call_operand.vmem [shape: bf16[32,1024], index: 1, kind: input, shape index: {}]   ;;  %s1733_s2 = inlined_call_operand.vmem [shape: f32[1,1024], index: 2, kind: input, shape index: {}]   ;;  %s1734_s3 = inlined_call_operand.vmem [shape: bf16[1024,32], index: 3, kind: input, shape index: {}]   ;;  %s1735_s4 = inlined_call_operand.vmem [shape: f32[1,32], index: 4, kind: input, shape index: {}]   ;;  %s1736_s5 = inlined_call_operand.hbm [shape: f32[16,32], index: 5, kind: output, shape index: {}]  }
   0x1   :  { %v961_v0 = vld [vmem:[%s1732_s1 + $0x40] sm:$0xf]  ;;  %v1263_v2 = vld [vmem:[%s1732_s1 + $0x44] sm:$0xf]  ;;  %v969_v5 = vld [vmem:[%s1732_s1 + $0x48] sm:$0xf] }
   0x2   :  { %v1267_v1 = vld [vmem:[%s1732_s1 + $0x5c] sm:$0xf0]  ;;  %v963_v4 = vld [vmem:[%s1732_s1 + $0x60] sm:$0xf0]  ;;  %v1268_v6 = vld [vmem:[%s1732_s1 + $0x64] sm:$0xf0] }
   0x3   :  { %v962_v3 = vor.u32 %v1267_v1, %v961_v0  ;;  %v966_v7 = vor.u32 %v1263_v2, %v963_v4  ;;  %v970_v8 = vor.u32 %v1268_v6, %v969_v5  ;;  %v1264_v9 = vld [vmem:[%s1732_s1 + $0x4c] sm:$0xf]  ;;  %v929_v11 = vld [vmem:[%s1732_s1] sm:$0xf]  ;;  %v1255_v14 = vld [vmem:[%s1732_s1 + $0x4] sm:$0xf] }
   0x4   :  { %v971_v10 = vld [vmem:[%s1732_s1 + $0x68] sm:$0xf0]  ;;  %v1259_v13 = vld [vmem:[%s1732_s1 + $0x1c] sm:$0xf0]  ;;  %v931_v15 = vld [vmem:[%s1732_s1 + $0x20] sm:$0xf0] }
   0x5   :  { %149 = vmatpush.bf16.msra.mxu0 %v962_v3  ;;  %v974_v12 = vor.u32 %v1264_v9, %v971_v10  ;;  %163 = vmatpush.bf16.msra.mxu1 %v966_v7  ;;  %v930_v16 = vor.u32 %v1259_v13, %v929_v11  ;;  %v934_v17 = vor.u32 %v1255_v14, %v931_v15  ;;  %v937_v18 = vld [vmem:[%s1732_s1 + $0x8] sm:$0xf]  ;;  %v1256_v20 = vld [vmem:[%s1732_s1 + $0xc] sm:$0xf]  ;;  %v22_v23 = vld [vmem:[%s1731_s0] sm:$0xff] }
   0x6   :  { %177 = vmatpush.bf16.msra.mxu2 %v970_v8  ;;  %v1260_v19 = vld [vmem:[%s1732_s1 + $0x24] sm:$0xf0]  ;;  %v939_v22 = vld [vmem:[%s1732_s1 + $0x28] sm:$0xf0]  ;;  %v985_v27 = vld [vmem:[%s1732_s1 + $0x58] sm:$0xf] }
   0x7   :  { %191 = vmatpush.bf16.msra.mxu3 %v974_v12  ;;  %v938_v21 = vor.u32 %v1260_v19, %v937_v18  ;;  %v23_v24 = vld [vmem:[%s1731_s0 + $0x8] sm:$0xff]  ;;  %v942_v25 = vor.u32 %v1256_v20, %v939_v22  ;;  %v1270_v28 = vld [vmem:[%s1732_s1 + $0x74] sm:$0xf0]  ;;  %v1266_v29 = vld [vmem:[%s1732_s1 + $0x5c] sm:$0xf] }
   0x8   :  { %v1452_v26 = vpack.c.bf16 %v23_v24, %v22_v23  ;;  %v986_v30 = vor.u32 %v1270_v28, %v985_v27  ;;  %v987_v31 = vld [vmem:[%s1732_s1 + $0x78] sm:$0xf0]  ;;  %v977_v32 = vld [vmem:[%s1732_s1 + $0x50] sm:$0xf]  ;;  %v953_v36 = vld [vmem:[%s1732_s1 + $0x18] sm:$0xf] }
   0x9   :  { %150 = vmatpush.bf16.msra.mxu0 %v930_v16  ;;  %v1269_v33 = vld [vmem:[%s1732_s1 + $0x6c] sm:$0xf0]  ;;  %164 = vmatpush.bf16.msra.mxu1 %v934_v17  ;;  %v990_v34 = vor.u32 %v1266_v29, %v987_v31  ;;  %v1262_v37 = vld [vmem:[%s1732_s1 + $0x34] sm:$0xf0]  ;;  %v1265_v38 = vld [vmem:[%s1732_s1 + $0x54] sm:$0xf] }
   0xa   :  { %178 = vmatpush.bf16.msra.mxu2 %v938_v21  ;;  %v978_v35 = vor.u32 %v1269_v33, %v977_v32  ;;  %v954_v39 = vor.u32 %v1262_v37, %v953_v36  ;;  %v979_v40 = vld [vmem:[%s1732_s1 + $0x70] sm:$0xf0]  ;;  %v1258_v41 = vld [vmem:[%s1732_s1 + $0x1c] sm:$0xf]  ;;  %v945_v45 = vld [vmem:[%s1732_s1 + $0x10] sm:$0xf] }
   0xb   :  { %192 = vmatpush.bf16.msra.mxu3 %v942_v25  ;;  %v955_v42 = vld [vmem:[%s1732_s1 + $0x38] sm:$0xf0]  ;;  %v982_v43 = vor.u32 %v1265_v38, %v979_v40  ;;  %v1261_v46 = vld [vmem:[%s1732_s1 + $0x2c] sm:$0xf0]  ;;  %v1257_v47 = vld [vmem:[%s1732_s1 + $0x14] sm:$0xf] }
   0xc   :  { %991 = vmatmul.msk.bf16.vlgmr.msra.gmra.mxu0 %vm139_vm0, %v1452_v26  ;;  %v958_v44 = vor.u32 %v1258_v41, %v955_v42  ;;  %992 = vmatmul.msk.bf16.vlgmr.msra.gmra.mxu1 %vm139_vm0, %v1452_v26  ;;  %v947_v48 = vld [vmem:[%s1732_s1 + $0x30] sm:$0xf0]  ;;  %v946_v49 = vor.u32 %v1261_v46, %v945_v45  ;;  %v1294_v50 = vld [vmem:[%s1734_s3 + $0xb8] sm:$0xff]  ;;  %v1292_v59 = vld [vmem:[%s1734_s3 + $0xa8] sm:$0xff] }
   0xd   :  { %993 = vmatmul.msk.bf16.vlgmr.msra.gmra.mxu2 %vm139_vm0, %v1452_v26  ;;  %205 = vmatpush.bf16.msrb.mxu0 %v978_v35  ;;  %v950_v51 = vor.u32 %v1257_v47, %v947_v48  ;;  %v1278_v52 = vld [vmem:[%s1734_s3 + $0x38] sm:$0xff]  ;;  %v1293_v55 = vld [vmem:[%s1734_s3 + $0xb0] sm:$0xff]  ;;  %v1300_v60 = vld [vmem:[%s1734_s3 + $0xe8] sm:$0xff] }
   0xe   :  { %233 = vmatpush.bf16.msrb.mxu2 %v986_v30  ;;  %994 = vmatmul.msk.bf16.vlgmr.msra.gmra.mxu3 %vm139_vm0, %v1452_v26  ;;  %v1302_v53 = vld [vmem:[%s1734_s3 + $0xf8] sm:$0xff]  ;;  %v1301_v56 = vld [vmem:[%s1734_s3 + $0xf0] sm:$0xff]  ;;  %v1276_v61 = vld [vmem:[%s1734_s3 + $0x28] sm:$0xff] }
   0xf   :  { %247 = vmatpush.bf16.msrb.mxu3 %v990_v34  ;;  %219 = vmatpush.bf16.msrb.mxu1 %v982_v43  ;;  %v1286_v54 = vld [vmem:[%s1734_s3 + $0x78] sm:$0xff]  ;;  %v1277_v57 = vld [vmem:[%s1734_s3 + $0x30] sm:$0xff] }
  0x10   :  { %v1285_v58 = vld [vmem:[%s1734_s3 + $0x70] sm:$0xff] }
  0x11   :  { %206 = vmatpush.bf16.msrb.mxu0 %v946_v49 }
  0x12   :  { %234 = vmatpush.bf16.msrb.mxu2 %v954_v39 }
  0x13   :  { %248 = vmatpush.bf16.msrb.mxu3 %v958_v44  ;;  %220 = vmatpush.bf16.msrb.mxu1 %v950_v51 }
  0x15   :  { %795 = vmatpush.bf16.msra.mxu0 %v1278_v52 }
  0x16   :  { %823 = vmatpush.bf16.msra.mxu2 %v1294_v50 }
  0x17   :  { %837 = vmatpush.bf16.msra.mxu3 %v1302_v53  ;;  %809 = vmatpush.bf16.msra.mxu1 %v1286_v54 }
  0x19   :  { %796 = vmatpush.bf16.msra.mxu0 %v1277_v57 }
  0x1a   :  { %824 = vmatpush.bf16.msra.mxu2 %v1293_v55 }
  0x1b   :  { %838 = vmatpush.bf16.msra.mxu3 %v1301_v56 }
  0x1c   :  { %10 = vsyncpa [#allocation3], 0  ;;  %810 = vmatpush.bf16.msra.mxu1 %v1285_v58  ;;  %v1284_v62 = vld [vmem:[%s1734_s3 + $0x68] sm:$0xff]  ;;  %v1291_v63 = vld [vmem:[%s1734_s3 + $0xa0] sm:$0xff]  ;;  %995 = vmatmul.msk.bf16.vlgmr.msrb.gmra.mxu0 %vm139_vm0, %v1452_v26  ;;  %s915_s8 = sshll.u32 %s1736_s5, 4  ;;  %s1366_s9 = smov 128   ;;  %s916_s8 = int_to_ptr.hbm [resolvable:$true] %s915_s8 }
  0x1d   :  { %797 = vmatpush.bf16.msra.mxu0 %v1276_v61  ;;  %v1275_v0 = vld [vmem:[%s1734_s3 + $0x20] sm:$0xff]  ;;  %996 = vmatmul.msk.bf16.vlgmr.msrb.gmra.mxu1 %vm139_vm0, %v1452_v26  ;;  %v1290_v3 = vld [vmem:[%s1734_s3 + $0x98] sm:$0xff]  ;;  %v1289_v7 = vld [vmem:[%s1734_s3 + $0x90] sm:$0xff]  ;;  %s1367_s10 = smov 8  }
  0x1e   :  { %825 = vmatpush.bf16.msra.mxu2 %v1292_v59  ;;  %v1299_v1 = vld [vmem:[%s1734_s3 + $0xe0] sm:$0xff]  ;;  %998 = vmatmul.msk.bf16.vlgmr.msrb.gmra.mxu3 %vm139_vm0, %v1452_v26  ;;  %v1274_v4 = vld [vmem:[%s1734_s3 + $0x18] sm:$0xff]  ;;  %v1273_v8 = vld [vmem:[%s1734_s3 + $0x10] sm:$0xff] }
  0x1f   :  { %839 = vmatpush.bf16.msra.mxu3 %v1300_v60  ;;  %v1283_v2 = vld [vmem:[%s1734_s3 + $0x60] sm:$0xff]  ;;  %997 = vmatmul.msk.bf16.vlgmr.msrb.gmra.mxu2 %vm139_vm0, %v1452_v26  ;;  %v1298_v5 = vld [vmem:[%s1734_s3 + $0xd8] sm:$0xff]  ;;  %v1297_v9 = vld [vmem:[%s1734_s3 + $0xd0] sm:$0xff] }
  0x20   :  { %811 = vmatpush.bf16.msra.mxu1 %v1284_v62  ;;  %v1282_v6 = vld [vmem:[%s1734_s3 + $0x58] sm:$0xff]  ;;  %v1281_v10 = vld [vmem:[%s1734_s3 + $0x50] sm:$0xff]  ;;  %v1272_v11 = vld [vmem:[%s1734_s3 + $0x8] sm:$0xff] }
  0x21   :  { %798 = vmatpush.bf16.msra.mxu0 %v1275_v0  ;;  %v1280_v12 = vld [vmem:[%s1734_s3 + $0x48] sm:$0xff]  ;;  %v1271_v13 = vld [vmem:[%s1734_s3] sm:$0xff]  ;;  %v1310_v15 = vld [vmem:[%s1734_s3 + $0x138] sm:$0xff] }
  0x22   :  { %826 = vmatpush.bf16.msra.mxu2 %v1291_v63  ;;  %v1279_v14 = vld [vmem:[%s1734_s3 + $0x40] sm:$0xff]  ;;  %v1318_v16 = vld [vmem:[%s1734_s3 + $0x178] sm:$0xff]  ;;  %v1288_v17 = vld [vmem:[%s1734_s3 + $0x88] sm:$0xff] }
  0x23   :  { %840 = vmatpush.bf16.msra.mxu3 %v1299_v1  ;;  %v1296_v18 = vld [vmem:[%s1734_s3 + $0xc8] sm:$0xff]  ;;  %v1309_v19 = vld [vmem:[%s1734_s3 + $0x130] sm:$0xff]  ;;  %v1287_v21 = vld [vmem:[%s1734_s3 + $0x80] sm:$0xff] }
  0x24   :  { %812 = vmatpush.bf16.msra.mxu1 %v1283_v2  ;;  %v1317_v20 = vld [vmem:[%s1734_s3 + $0x170] sm:$0xff]  ;;  %v1295_v22 = vld [vmem:[%s1734_s3 + $0xc0] sm:$0xff]  ;;  %v1326_v23 = vld [vmem:[%s1734_s3 + $0x1b8] sm:$0xff] }
  0x25   :  { %799 = vmatpush.bf16.msra.mxu0 %v1274_v4  ;;  %v1334_v24 = vld [vmem:[%s1734_s3 + $0x1f8] sm:$0xff]  ;;  %v1308_v25 = vld [vmem:[%s1734_s3 + $0x128] sm:$0xff]  ;;  %v1325_v27 = vld [vmem:[%s1734_s3 + $0x1b0] sm:$0xff] }
  0x26   :  { %827 = vmatpush.bf16.msra.mxu2 %v1290_v3  ;;  %v1316_v26 = vld [vmem:[%s1734_s3 + $0x168] sm:$0xff]  ;;  %v1333_v28 = vld [vmem:[%s1734_s3 + $0x1f0] sm:$0xff]  ;;  %v1307_v29 = vld [vmem:[%s1734_s3 + $0x120] sm:$0xff] }
  0x27   :  { %841 = vmatpush.bf16.msra.mxu3 %v1298_v5  ;;  %v1315_v30 = vld [vmem:[%s1734_s3 + $0x160] sm:$0xff]  ;;  %v1324_v31 = vld [vmem:[%s1734_s3 + $0x1a8] sm:$0xff]  ;;  %v1306_v33 = vld [vmem:[%s1734_s3 + $0x118] sm:$0xff] }
  0x28   :  { %813 = vmatpush.bf16.msra.mxu1 %v1282_v6  ;;  %v1332_v32 = vld [vmem:[%s1734_s3 + $0x1e8] sm:$0xff]  ;;  %v1314_v34 = vld [vmem:[%s1734_s3 + $0x158] sm:$0xff]  ;;  %v1323_v35 = vld [vmem:[%s1734_s3 + $0x1a0] sm:$0xff] }
  0x29   :  { %800 = vmatpush.bf16.msra.mxu0 %v1273_v8  ;;  %v1331_v36 = vld [vmem:[%s1734_s3 + $0x1e0] sm:$0xff]  ;;  %v1305_v37 = vld [vmem:[%s1734_s3 + $0x110] sm:$0xff]  ;;  %v1322_v39 = vld [vmem:[%s1734_s3 + $0x198] sm:$0xff] }
  0x2a   :  { %828 = vmatpush.bf16.msra.mxu2 %v1289_v7  ;;  %v1313_v38 = vld [vmem:[%s1734_s3 + $0x150] sm:$0xff]  ;;  %v1330_v40 = vld [vmem:[%s1734_s3 + $0x1d8] sm:$0xff]  ;;  %v1304_v41 = vld [vmem:[%s1734_s3 + $0x108] sm:$0xff] }
  0x2b   :  { %842 = vmatpush.bf16.msra.mxu3 %v1297_v9  ;;  %v1312_v42 = vld [vmem:[%s1734_s3 + $0x148] sm:$0xff]  ;;  %v1321_v43 = vld [vmem:[%s1734_s3 + $0x190] sm:$0xff]  ;;  %v1303_v45 = vld [vmem:[%s1734_s3 + $0x100] sm:$0xff] }
  0x2c   :  { %814 = vmatpush.bf16.msra.mxu1 %v1281_v10  ;;  %v1329_v44 = vld [vmem:[%s1734_s3 + $0x1d0] sm:$0xff]  ;;  %v1311_v46 = vld [vmem:[%s1734_s3 + $0x140] sm:$0xff]  ;;  %v1320_v47 = vld [vmem:[%s1734_s3 + $0x188] sm:$0xff] }
  0x2d   :  { %801 = vmatpush.bf16.msra.mxu0 %v1272_v11  ;;  %v1328_v48 = vld [vmem:[%s1734_s3 + $0x1c8] sm:$0xff]  ;;  %v1707_v49 = vld [vmem:[%s1733_s2] sm:$0xff] }
  0x2e   :  { %829 = vmatpush.bf16.msra.mxu2 %v1288_v17  ;;  %v43_v51 = vperm.slane %v1707_v49, 0  ;;  %v44_v53 = vperm.slane %v1707_v49, 1  ;;  %v1319_v54 = vld [vmem:[%s1734_s3 + $0x180] sm:$0xff]  ;;  %v45_v1 = vperm.slane %v1707_v49, 2  ;;  %v46_v3 = vperm.slane %v1707_v49, 3 }
  0x2f   :  { %843 = vmatpush.bf16.msra.mxu3 %v1296_v18  ;;  %v1327_v55 = vld [vmem:[%s1734_s3 + $0x1c0] sm:$0xff] }
  0x30   :  { %815 = vmatpush.bf16.msra.mxu1 %v1280_v12 }
  0x31   :  { %802 = vmatpush.bf16.msra.mxu0 %v1271_v13 }
  0x32   :  { %830 = vmatpush.bf16.msra.mxu2 %v1287_v21 }
  0x33   :  { %844 = vmatpush.bf16.msra.mxu3 %v1295_v22 }
  0x34   :  { %816 = vmatpush.bf16.msra.mxu1 %v1279_v14 }
  0x35   :  { %851 = vmatpush.bf16.msrb.mxu0 %v1310_v15  ;;  %v47_v15 = vperm.slane %v1707_v49, 4 }
  0x36   :  { %879 = vmatpush.bf16.msrb.mxu2 %v1326_v23 }
  0x37   :  { %893 = vmatpush.bf16.msrb.mxu3 %v1334_v24 }
  0x38   :  { %865 = vmatpush.bf16.msrb.mxu1 %v1318_v16 }
  0x39   :  { %852 = vmatpush.bf16.msrb.mxu0 %v1309_v19  ;;  %v48_v19 = vperm.slane %v1707_v49, 5 }
  0x3a   :  { %880 = vmatpush.bf16.msrb.mxu2 %v1325_v27 }
  0x3b   :  { %894 = vmatpush.bf16.msrb.mxu3 %v1333_v28 }
  0x3c   :  { %866 = vmatpush.bf16.msrb.mxu1 %v1317_v20 }
  0x3d   :  { %853 = vmatpush.bf16.msrb.mxu0 %v1308_v25 }
  0x3e   :  { %881 = vmatpush.bf16.msrb.mxu2 %v1324_v31 }
  0x3f   :  { %895 = vmatpush.bf16.msrb.mxu3 %v1332_v32 }
  0x40   :  { %867 = vmatpush.bf16.msrb.mxu1 %v1316_v26 }
  0x41   :  { %854 = vmatpush.bf16.msrb.mxu0 %v1307_v29 }
  0x42   :  { %882 = vmatpush.bf16.msrb.mxu2 %v1323_v35  ;;  %v50_v35 = vperm.slane %v1707_v49, 7 }
  0x43   :  { %896 = vmatpush.bf16.msrb.mxu3 %v1331_v36 }
  0x44   :  { %868 = vmatpush.bf16.msrb.mxu1 %v1315_v30 }
  0x45   :  { %855 = vmatpush.bf16.msrb.mxu0 %v1306_v33  ;;  %v49_v33 = vperm.slane %v1707_v49, 6 }
  0x46   :  { %883 = vmatpush.bf16.msrb.mxu2 %v1322_v39 }
  0x47   :  { %897 = vmatpush.bf16.msrb.mxu3 %v1330_v40 }
  0x48   :  { %869 = vmatpush.bf16.msrb.mxu1 %v1314_v34 }
  0x49   :  { %856 = vmatpush.bf16.msrb.mxu0 %v1305_v37 }
  0x4a   :  { %884 = vmatpush.bf16.msrb.mxu2 %v1321_v43 }
  0x4b   :  { %898 = vmatpush.bf16.msrb.mxu3 %v1329_v44 }
  0x4c   :  { %870 = vmatpush.bf16.msrb.mxu1 %v1313_v38 }
  0x4d   :  { %857 = vmatpush.bf16.msrb.mxu0 %v1304_v41 }
  0x4e   :  { %885 = vmatpush.bf16.msrb.mxu2 %v1320_v47 }
  0x4f   :  { %899 = vmatpush.bf16.msrb.mxu3 %v1328_v48 }
  0x50   :  { %871 = vmatpush.bf16.msrb.mxu1 %v1312_v42 }
  0x51   :  { %858 = vmatpush.bf16.msrb.mxu0 %v1303_v45 }
  0x52   :  { %886 = vmatpush.bf16.msrb.mxu2 %v1319_v54  ;;  %v1338_v54 = vld [vmem:[%s1735_s4] ss:$0 sm:$0xff]  ;;  %s1365_s4 = smov [#allocation2]  }
  0x53   :  { %900 = vmatpush.bf16.msrb.mxu3 %v1327_v55  ;;  %s913_s30 = sshll.u32 %s1365_s4, 4  ;;  %s914_s30 = int_to_ptr.vmem [resolvable:$true] %s913_s30 }
  0x54   :  { %872 = vmatpush.bf16.msrb.mxu1 %v1311_v46 }
  0x89   :  { %v152_v50 = vpop.f32.mrf.mxu0  ;;  %v166_v52 = vpop.f32.mrf.mxu1 }
  0x8a   :  { %v153_v56 = vadd.f32 %v152_v50, %v43_v51  ;;  %v167_v57 = vadd.f32 %v166_v52, %v44_v53 }
  0x8c   :  { %v255_v61 = vmax.f32 %v153_v56, 0.0  ;;  %v256_v0 = vmax.f32 %v167_v57, 0.0 }
  0x90   :  { %v180_v58 = vpop.f32.mrf.mxu2 }
  0x91   :  { %v194_v59 = vpop.f32.mrf.mxu3  ;;  %v154_v60 = vpop.f32.mrf.mxu0  ;;  %v181_v7 = vadd.f32 %v180_v58, %v45_v1 }
  0x92   :  { %v155_v62 = vadd.f32 %v154_v60, %v43_v51  ;;  %v168_v63 = vpop.f32.mrf.mxu1  ;;  %v195_v9 = vadd.f32 %v194_v59, %v46_v3 }
  0x93   :  { %v169_v2 = vadd.f32 %v168_v63, %v44_v53  ;;  %v257_v17 = vmax.f32 %v181_v7, 0.0 }
  0x94   :  { %v263_v4 = vmax.f32 %v155_v62, 0.0  ;;  %v258_v20 = vmax.f32 %v195_v9, 0.0 }
  0x95   :  { %v264_v5 = vmax.f32 %v169_v2, 0.0 }
  0x96   :  { %v271_v6 = vpack.c.bf16 %v263_v4, %v255_v61 }
  0x97   :  { %v272_v8 = vpack.c.bf16 %v264_v5, %v256_v0 }
  0x98   :  { %v182_v10 = vpop.f32.mrf.mxu2  ;;  %803 = vmatmul.bf16.vlgmr.msra.gmra.mxu0 %v271_v6 }
  0x99   :  { %v183_v11 = vadd.f32 %v182_v10, %v45_v1  ;;  %v196_v12 = vpop.f32.mrf.mxu3  ;;  %817 = vmatmul.bf16.vlgmr.msra.gmra.mxu1 %v272_v8  ;;  %v208_v13 = vpop.f32.mrf.mxu0 }
  0x9a   :  { %v197_v14 = vadd.f32 %v196_v12, %v46_v3  ;;  %v222_v16 = vpop.f32.mrf.mxu1  ;;  %v209_v24 = vadd.f32 %v208_v13, %v47_v15 }
  0x9b   :  { %v265_v18 = vmax.f32 %v183_v11, 0.0  ;;  %v223_v25 = vadd.f32 %v222_v16, %v48_v19 }
  0x9c   :  { %v266_v21 = vmax.f32 %v197_v14, 0.0  ;;  %v259_v29 = vmax.f32 %v209_v24, 0.0 }
  0x9d   :  { %v273_v22 = vpack.c.bf16 %v265_v18, %v257_v17  ;;  %v260_v32 = vmax.f32 %v223_v25, 0.0 }
  0x9e   :  { %v274_v23 = vpack.c.bf16 %v266_v21, %v258_v20 }
  0x9f   :  { %831 = vmatmul.bf16.vlgmr.msra.gmra.mxu2 %v273_v22 }
  0xa0   :  { %845 = vmatmul.bf16.vlgmr.msra.gmra.mxu3 %v274_v23 }
  0xa1   :  { %v250_v27 = vpop.f32.mrf.mxu3  ;;  %v210_v28 = vpop.f32.mrf.mxu0 }
  0xa2   :  { %v236_v26 = vpop.f32.mrf.mxu2  ;;  %v211_v30 = vadd.f32 %v210_v28, %v47_v15  ;;  %v224_v31 = vpop.f32.mrf.mxu1  ;;  %v251_v41 = vadd.f32 %v250_v27, %v50_v35 }
  0xa3   :  { %v225_v34 = vadd.f32 %v224_v31, %v48_v19  ;;  %v237_v39 = vadd.f32 %v236_v26, %v49_v33 }
  0xa4   :  { %v267_v36 = vmax.f32 %v211_v30, 0.0  ;;  %v262_v48 = vmax.f32 %v251_v41, 0.0 }
  0xa5   :  { %v268_v37 = vmax.f32 %v225_v34, 0.0  ;;  %v261_v46 = vmax.f32 %v237_v39, 0.0 }
  0xa6   :  { %v275_v38 = vpack.c.bf16 %v267_v36, %v259_v29 }
  0xa7   :  { %v276_v40 = vpack.c.bf16 %v268_v37, %v260_v32 }
  0xa8   :  { %859 = vmatmul.bf16.vlgmr.msrb.gmra.mxu0 %v275_v38 }
  0xa9   :  { %v252_v44 = vpop.f32.mrf.mxu3  ;;  %873 = vmatmul.bf16.vlgmr.msrb.gmra.mxu1 %v276_v40 }
  0xaa   :  { %v238_v42 = vpop.f32.mrf.mxu2  ;;  %v253_v45 = vadd.f32 %v252_v44, %v50_v35 }
  0xab   :  { %v239_v43 = vadd.f32 %v238_v42, %v49_v33 }
  0xac   :  { %v270_v50 = vmax.f32 %v253_v45, 0.0 }
  0xad   :  { %v269_v47 = vmax.f32 %v239_v43, 0.0 }
  0xae   :  { %v278_v52 = vpack.c.bf16 %v270_v50, %v262_v48 }
  0xaf   :  { %v277_v51 = vpack.c.bf16 %v269_v47, %v261_v46 }
  0xb0   :  { %901 = vmatmul.bf16.vlgmr.msrb.gmra.mxu3 %v278_v52 }
  0xb1   :  { %887 = vmatmul.bf16.vlgmr.msrb.gmra.mxu2 %v277_v51 }
 0x115   :  { %v804_v49 = vpop.f32.mrf.mxu0 }
 0x116   :  { %v818_v53 = vpop.f32.mrf.mxu1  ;;  %v805_v56 = vadd.f32 %v1338_v54, %v804_v49 }
 0x118   :  { %v819_v58 = vadd.f32 %v818_v53, %v805_v56 }
 0x11d   :  { %v806_v55 = vpop.f32.mrf.mxu0 }
 0x11e   :  { %v820_v60 = vpop.f32.mrf.mxu1  ;;  %v807_v62 = vadd.f32 %v1338_v54, %v806_v55 }
 0x120   :  { %v821_v2 = vadd.f32 %v820_v60, %v807_v62 }
 0x122   :  { %v832_v57 = vpop.f32.mrf.mxu2 }
 0x123   :  { %v846_v59 = vpop.f32.mrf.mxu3  ;;  %v833_v61 = vadd.f32 %v832_v57, %v819_v58 }
 0x125   :  { %v860_v63 = vpop.f32.mrf.mxu0  ;;  %v847_v0 = vadd.f32 %v846_v59, %v833_v61 }
 0x126   :  { %v874_v6 = vpop.f32.mrf.mxu1 }
 0x127   :  { %v861_v4 = vadd.f32 %v860_v63, %v847_v0 }
 0x129   :  { %v875_v7 = vadd.f32 %v874_v6, %v861_v4 }
 0x12a   :  { %v834_v1 = vpop.f32.mrf.mxu2 }
 0x12b   :  { %v848_v3 = vpop.f32.mrf.mxu3  ;;  %v835_v5 = vadd.f32 %v834_v1, %v821_v2 }
 0x12d   :  { %v849_v8 = vadd.f32 %v848_v3, %v835_v5  ;;  %v862_v9 = vpop.f32.mrf.mxu0 }
 0x12e   :  { %v876_v15 = vpop.f32.mrf.mxu1 }
 0x12f   :  { %v863_v13 = vadd.f32 %v862_v9, %v849_v8 }
 0x131   :  { %v877_v16 = vadd.f32 %v876_v15, %v863_v13 }
 0x133   :  { %v902_v12 = vpop.f32.mrf.mxu3 }
 0x134   :  { %v888_v10 = vpop.f32.mrf.mxu2 }
 0x135   :  { %v889_v11 = vadd.f32 %v888_v10, %v875_v7 }
 0x137   :  { %v903_v14 = vadd.f32 %v902_v12, %v889_v11 }
 0x139   :  { %907 = vst.msk [vmem:[#allocation2] sm:$0xff] %vm139_vm0, %v903_v14 }
 0x13b   :  { %v904_v19 = vpop.f32.mrf.mxu3 }
 0x13c   :  { %v890_v17 = vpop.f32.mrf.mxu2 }
 0x13d   :  { %v891_v18 = vadd.f32 %v890_v17, %v877_v16 }
 0x13f   :  { %v905_v20 = vadd.f32 %v904_v19, %v891_v18 }
 0x141   :  { %908 = vst.msk [vmem:[#allocation2 + $0x8] sm:$0xff] %vm139_vm0, %v905_v20 }
 0x142   :  { %921 = dma.vmem_to_hbm [thread:$0]  %s914_s30, 256, %s916_s8, [#allocation3], %s1366_s9, %s1366_s9, %s1367_s10  }
 0x143   :  { %1363 = dma.done.wait [#allocation3], 256  }
 0x144   :  { %1364 = vsyncadd [#allocation3], 4294967040 }
 0x145   :  { %926 = vsyncpa [#allocation3], 1 }

</bundles_post_ra>
